<compile_context>
chip_gen: v7x
topology: tpu7x:2x2x1
jax: 0.10.0
libtpu: 0.0.40
codegen_flags: <defaults>
</compile_context>

<pallas_src>
import functools
import math

import jax
import jax.numpy as jnp
from jax.experimental import pallas as pl
from jax.experimental.pallas import tpu as pltpu


# ----------------------------------------------------------------------------
# Kernel: fused spatio_conv_layer.forward for one row tile of the graph.
# ----------------------------------------------------------------------------
def _spatio_conv_kernel(lk_ref, xin_ref, xst_ref, th_in_ref, th_st_ref, b_ref,
                        o_ref, *, batch, d_in, d_state, activation):
    lk = lk_ref[...]                                        # (tn, N)
    # Graph propagation for ALL batches in one wide MXU matmul per operand
    # (batch folded into the lane dimension).
    lfs_in = jnp.dot(lk, xin_ref[...], preferred_element_type=jnp.float32)   # (tn, B*d_in)
    lfs_st = jnp.dot(lk, xst_ref[...], preferred_element_type=jnp.float32)   # (tn, B*d_state)

    th_in = th_in_ref[...]                                  # (d_in,    c_out)
    th_st = th_st_ref[...]                                  # (d_state, c_out)
    bias = b_ref[...]                                       # (1, c_out), f32
    cdt = th_in.dtype

    outs = []
    for bi in range(batch):                                 # static unroll (B is small)
        pi = lfs_in[:, bi * d_in:(bi + 1) * d_in].astype(cdt)
        ps = lfs_st[:, bi * d_state:(bi + 1) * d_state].astype(cdt)
        # (Lk@[inp;state]) @ theta == (Lk@inp)@theta_top + (Lk@state)@theta_bot
        t = (jnp.dot(pi, th_in, preferred_element_type=jnp.float32)
             + jnp.dot(ps, th_st, preferred_element_type=jnp.float32))
        t = jnp.maximum(t, 0.0) + bias                      # relu THEN bias (as in torch code)
        if activation == "sigmoid":                         # fused STGRU epilogue (EUP)
            t = 1.0 / (1.0 + jnp.exp(-t))
        elif activation == "tanh":
            t = jnp.tanh(t)
        outs.append(t)

    # One lane-dense store: (tn, B*c_out).
    o_ref[...] = jnp.concatenate(outs, axis=-1).astype(o_ref.dtype)


def _row_tile(n):
    for t in (512, 256, 128, 64, 32, 16, 8):
        if n % t == 0:
            return t
    return n  # full dim (always legal for a BlockSpec)


def spatio_conv_forward(inp_nm, state_nm, Lk, theta, bias, *,
                        activation="none", compute_dtype=None):
    """spatio_conv_layer.forward on node-major activations.

    inp_nm: (N, B, d_in)  state_nm: (N, B, d_state)  Lk: (N, N)
    theta:  (d_in + d_state, c_out)   bias: (1, 1, c_out)
    returns (N, B, c_out) f32 == relu(Lk @ [inp;state] @ theta) + bias,
    optionally followed by a fused sigmoid / tanh.
    """
    N, B, d_in = inp_nm.shape
    d_state = state_nm.shape[2]
    c_out = theta.shape[1]
    assert theta.shape[0] == d_in + d_state

    cdt = jnp.float32 if compute_dtype is None else compute_dtype
    xin = inp_nm.reshape(N, B * d_in).astype(cdt)           # free reshape (node-major)
    xst = state_nm.reshape(N, B * d_state).astype(cdt)
    lk = Lk.astype(cdt)
    th_in = theta[:d_in].astype(cdt)
    th_st = theta[d_in:].astype(cdt)
    b2 = bias.reshape(1, c_out).astype(jnp.float32)

    tn = _row_tile(N)
    grid = (N // tn,)

    kern = functools.partial(_spatio_conv_kernel, batch=B, d_in=d_in,
                             d_state=d_state, activation=activation)

    flops = 2 * N * N * B * (d_in + d_state) + 2 * N * B * (d_in + d_state) * c_out
    transcendentals = N * B * c_out if activation in ("sigmoid", "tanh") else 0
    bytes_accessed = (lk.size * lk.dtype.itemsize + xin.size * xin.dtype.itemsize
                      + xst.size * xst.dtype.itemsize
                      + th_in.size * th_in.dtype.itemsize
                      + th_st.size * th_st.dtype.itemsize
                      + b2.size * 4 + N * B * c_out * 4)

    # Rough VMEM need (double-buffered row tiles + resident operands); only raise
    # the scoped limit for large graphs, stay generation-safe (v7x has 64 MiB).
    need = 4 * (2 * tn * N + N * B * (d_in + d_state)
                + 2 * tn * B * c_out + (d_in + d_state) * c_out + c_out)
    vmem_limit = int(min(2 * need, 64 * 1024 * 1024)) if need > (24 << 20) else None

    out2d = pl.pallas_call(
        kern,
        out_shape=jax.ShapeDtypeStruct((N, B * c_out), jnp.float32),
        grid=grid,
        in_specs=[
            pl.BlockSpec((tn, N), lambda i: (i, 0)),            # Lk row tile
            pl.BlockSpec((N, B * d_in), lambda i: (0, 0)),      # input   (resident)
            pl.BlockSpec((N, B * d_state), lambda i: (0, 0)),   # state   (resident)
            pl.BlockSpec((d_in, c_out), lambda i: (0, 0)),      # theta top rows
            pl.BlockSpec((d_state, c_out), lambda i: (0, 0)),   # theta bottom rows
            pl.BlockSpec((1, c_out), lambda i: (0, 0)),         # bias
        ],
        out_specs=pl.BlockSpec((tn, B * c_out), lambda i: (i, 0)),
        compiler_params=pltpu.CompilerParams(
            dimension_semantics=("parallel",),
            vmem_limit_bytes=vmem_limit),
        cost_estimate=pl.CostEstimate(flops=flops,
                                      transcendentals=transcendentals,
                                      bytes_accessed=bytes_accessed),
    )(lk, xin, xst, th_in, th_st, b2)

    return out2d.reshape(N, B, c_out)                        # free reshape


# ----------------------------------------------------------------------------
# STGRU cell + EncoderModel (node-major internally; gating is XLA elementwise glue)
# ----------------------------------------------------------------------------
def stgru_cell_forward(p, Lk, inp_nm, state_nm, compute_dtype=None):
    rnn = p["gcn2_theta"].shape[1]
    # value = sigmoid(gcn_1(input, state))  -- sigmoid fused into the kernel
    value = spatio_conv_forward(inp_nm, state_nm, Lk, p["gcn1_theta"], p["gcn1_b"],
                                activation="sigmoid", compute_dtype=compute_dtype)
    r = value[..., :rnn]
    u = value[..., rnn:]
    # c = tanh(gcn_2(input, r*state))       -- tanh fused into the kernel
    c = spatio_conv_forward(inp_nm, r * state_nm, Lk, p["gcn2_theta"], p["gcn2_b"],
                            activation="tanh", compute_dtype=compute_dtype)
    return u * state_nm + (1.0 - u) * c


def encoder_forward(params, Lk, inputs, hidden_state=None, compute_dtype=None):
    """EncoderModel.forward. inputs: (B, N, input_dim) ->
    (output (B, N, rnn), hidden (num_layers, B, N, rnn))."""
    B, N, _ = inputs.shape
    layers = params["layers"]
    rnn = layers[0]["gcn2_theta"].shape[1]

    out_nm = jnp.transpose(inputs, (1, 0, 2))               # single boundary transpose
    if hidden_state is None:
        hidden_nm = [jnp.zeros((N, B, rnn), jnp.float32) for _ in layers]
    else:
        hidden_nm = [jnp.transpose(hidden_state[l], (1, 0, 2)) for l in range(len(layers))]

    new_states = []
    for l, p in enumerate(layers):
        out_nm = stgru_cell_forward(p, Lk, out_nm, hidden_nm[l], compute_dtype=compute_dtype)
        new_states.append(out_nm)

    output = jnp.transpose(out_nm, (1, 0, 2))
    hidden = jnp.stack([jnp.transpose(s, (1, 0, 2)) for s in new_states], axis=0)
    return output, hidden


# ----------------------------------------------------------------------------
# Parameter init (replicates spatio_conv_layer.reset_parameters bounds/shapes)
# ----------------------------------------------------------------------------
def _init_spatio_conv_params(key, c_in, c_out):
    # kaiming_uniform_(theta, a=sqrt(5)) on (c_in, c_out): torch fan_in = c_out,
    # bound = sqrt(3)*sqrt(2/(1+5))/sqrt(c_out) = 1/sqrt(c_out); bias same bound.
    k1, k2, k3, k4 = jax.random.split(key, 4)
    bt = 1.0 / math.sqrt(c_out)
    theta = jax.random.uniform(k1, (c_in, c_out), jnp.float32, -bt, bt)
    b = jax.random.uniform(k2, (1, 1, c_out), jnp.float32, -bt, bt)
    theta1 = jax.random.uniform(k3, (c_out, c_out), jnp.float32, -bt, bt)  # unused in forward
    b1 = jax.random.uniform(k4, (1, 1, c_out), jnp.float32, -bt, bt)       # unused in forward
    return theta, b, theta1, b1


def init_stgru_params(key, c_in, c_out):
    k1, k2 = jax.random.split(key)
    g1t, g1b, g1t1, g1b1 = _init_spatio_conv_params(k1, c_in, 2 * c_out)
    g2t, g2b, g2t1, g2b1 = _init_spatio_conv_params(k2, c_in, c_out)
    return {"gcn1_theta": g1t, "gcn1_b": g1b, "gcn2_theta": g2t, "gcn2_b": g2b,
            "gcn1_theta1": g1t1, "gcn1_b1": g1b1, "gcn2_theta1": g2t1, "gcn2_b1": g2b1}


def init_encoder_params(key, input_dim, rnn_unit):
    k1, k2 = jax.random.split(key)
    return {"layers": [init_stgru_params(k1, input_dim + rnn_unit, rnn_unit),
                       init_stgru_params(k2, 2 * rnn_unit, rnn_unit)]}


# ----------------------------------------------------------------------------
# Pure-JAX reference (mirrors the PyTorch module exactly, batch-major)
# ----------------------------------------------------------------------------
def _spatio_conv_ref(inp, state, Lk, theta, bias):
    x = jnp.concatenate([inp, state], axis=2)
    lfs = jnp.einsum('ij,jkl->kil', Lk, jnp.transpose(x, (1, 0, 2)),
                     precision=jax.lax.Precision.HIGHEST)
    return jax.nn.relu(jnp.matmul(lfs, theta, precision=jax.lax.Precision.HIGHEST)) + bias


def _stgru_ref(p, Lk, inp, state):
    rnn = p["gcn2_theta"].shape[1]
    value = jax.nn.sigmoid(_spatio_conv_ref(inp, state, Lk, p["gcn1_theta"], p["gcn1_b"]))
    r, u = value[..., :rnn], value[..., rnn:]
    c = jnp.tanh(_spatio_conv_ref(inp, r * state, Lk, p["gcn2_theta"], p["gcn2_b"]))
    return u * state + (1.0 - u) * c


def _encoder_ref(params, Lk, inputs):
    B, N, _ = inputs.shape
    rnn = params["layers"][0]["gcn2_theta"].shape[1]
    out, states = inputs, []
    for p in params["layers"]:
        out = _stgru_ref(p, Lk, out, jnp.zeros((B, N, rnn), jnp.float32))
        states.append(out)
    return out, jnp.stack(states, axis=0)


# ----------------------------------------------------------------------------
if __name__ == "__main__":
    key = jax.random.PRNGKey(0)
    B, N = 2, 16
    input_dim, rnn_unit, num_rnn_layers = 4, 32, 2

    k_in, k_lk, k_par = jax.random.split(key, 3)
    inputs = jax.random.normal(k_in, (B, N, input_dim), jnp.float32)
    Lk = jax.random.normal(k_lk, (N, N), jnp.float32) / math.sqrt(N)
    params = init_encoder_params(k_par, input_dim, rnn_unit)

    # f32 path
    fwd = jax.jit(functools.partial(encoder_forward, compute_dtype=None))
    out, hidden = jax.block_until_ready(fwd(params, Lk, inputs))
    assert out.shape == (B, N, rnn_unit)
    assert hidden.shape == (num_rnn_layers, B, N, rnn_unit)

    ref_out, ref_hidden = _encoder_ref(params, Lk, inputs)
    assert jnp.allclose(out, ref_out, atol=1e-4, rtol=1e-4), "output mismatch vs reference"
    assert jnp.allclose(hidden, ref_hidden, atol=1e-4, rtol=1e-4), "hidden mismatch vs reference"

    # bf16 MXU path (f32 accumulation, f32 epilogue) -- looser tolerance.
    fwd_bf16 = jax.jit(functools.partial(encoder_forward, compute_dtype=jnp.bfloat16))
    out_b, hidden_b = jax.block_until_ready(fwd_bf16(params, Lk, inputs))
    assert float(jnp.max(jnp.abs(out_b - ref_out))) < 0.25, "bf16 path diverged"

    print("KERNEL_OK")
</pallas_src>

<mosaic_0001>
module attributes {stable_mosaic.version = 11 : i64} {
  func.func @_spatio_conv_kernel(%arg0: i32, %arg1: memref<16x16xf32, #tpu.memory_space<vmem>>, %arg2: memref<16x8xf32, #tpu.memory_space<vmem>>, %arg3: memref<16x64xf32, #tpu.memory_space<vmem>>, %arg4: memref<4x64xf32, #tpu.memory_space<vmem>>, %arg5: memref<32x64xf32, #tpu.memory_space<vmem>>, %arg6: memref<1x64xf32, #tpu.memory_space<vmem>>, %arg7: memref<16x128xf32, #tpu.memory_space<vmem>>) attributes {dimension_semantics = [#tpu.dimension_semantics<parallel>], iteration_bounds = array<i64: 1>, scalar_prefetch = 0 : i64, scratch_operands = 0 : i64, tpu.core_type = #tpu.core_type<tc>, window_params = [{transform_indices = @transform_0, window_bounds = array<i64: 16, 16>}, {pipeline_mode = #tpu.pipeline_mode<synchronous>, transform_indices = @transform_1, window_bounds = array<i64: 16, 8>}, {pipeline_mode = #tpu.pipeline_mode<synchronous>, transform_indices = @transform_2, window_bounds = array<i64: 16, 64>}, {pipeline_mode = #tpu.pipeline_mode<synchronous>, transform_indices = @transform_3, window_bounds = array<i64: 4, 64>}, {pipeline_mode = #tpu.pipeline_mode<synchronous>, transform_indices = @transform_4, window_bounds = array<i64: 32, 64>}, {pipeline_mode = #tpu.pipeline_mode<synchronous>, transform_indices = @transform_5, window_bounds = array<i64: 1, 64>}, {transform_indices = @transform_6, window_bounds = array<i64: 16, 128>}]} {
    %c0 = arith.constant 0 : index
    %c0_0 = arith.constant 0 : index
    %0 = vector.load %arg1[%c0, %c0_0] : memref<16x16xf32, #tpu.memory_space<vmem>>, vector<16x16xf32>
    %c0_1 = arith.constant 0 : index
    %c0_2 = arith.constant 0 : index
    %1 = vector.load %arg2[%c0_1, %c0_2] : memref<16x8xf32, #tpu.memory_space<vmem>>, vector<16x8xf32>
    %cst = arith.constant dense<0.000000e+00> : vector<16x8xf32>
    %2 = tpu.matmul %0, %1, %cst {dimension_numbers = #tpu.dot_dimension_numbers<[1], [0], [0], [1], [0, 0, 1, 1], [], []>} : vector<16x16xf32>, vector<16x8xf32>, vector<16x8xf32> -> vector<16x8xf32>
    %c0_3 = arith.constant 0 : index
    %c0_4 = arith.constant 0 : index
    %3 = vector.load %arg3[%c0_3, %c0_4] : memref<16x64xf32, #tpu.memory_space<vmem>>, vector<16x64xf32>
    %cst_5 = arith.constant dense<0.000000e+00> : vector<16x64xf32>
    %4 = tpu.matmul %0, %3, %cst_5 {dimension_numbers = #tpu.dot_dimension_numbers<[1], [0], [0], [1], [0, 0, 1, 1], [], []>} : vector<16x16xf32>, vector<16x64xf32>, vector<16x64xf32> -> vector<16x64xf32>
    %c0_6 = arith.constant 0 : index
    %c0_7 = arith.constant 0 : index
    %5 = vector.load %arg4[%c0_6, %c0_7] : memref<4x64xf32, #tpu.memory_space<vmem>>, vector<4x64xf32>
    %c0_8 = arith.constant 0 : index
    %c0_9 = arith.constant 0 : index
    %6 = vector.load %arg5[%c0_8, %c0_9] : memref<32x64xf32, #tpu.memory_space<vmem>>, vector<32x64xf32>
    %c0_10 = arith.constant 0 : index
    %c0_11 = arith.constant 0 : index
    %7 = vector.load %arg6[%c0_10, %c0_11] : memref<1x64xf32, #tpu.memory_space<vmem>>, vector<1x64xf32>
    %8 = vector.extract_strided_slice %2 {offsets = [0, 0], sizes = [16, 4], strides = [1, 1]} : vector<16x8xf32> to vector<16x4xf32>
    %9 = vector.extract_strided_slice %4 {offsets = [0, 0], sizes = [16, 32], strides = [1, 1]} : vector<16x64xf32> to vector<16x32xf32>
    %cst_12 = arith.constant dense<0.000000e+00> : vector<16x64xf32>
    %10 = tpu.matmul %8, %5, %cst_12 {dimension_numbers = #tpu.dot_dimension_numbers<[1], [0], [0], [1], [0, 0, 1, 1], [], []>} : vector<16x4xf32>, vector<4x64xf32>, vector<16x64xf32> -> vector<16x64xf32>
    %cst_13 = arith.constant dense<0.000000e+00> : vector<16x64xf32>
    %11 = tpu.matmul %9, %6, %cst_13 {dimension_numbers = #tpu.dot_dimension_numbers<[1], [0], [0], [1], [0, 0, 1, 1], [], []>} : vector<16x32xf32>, vector<32x64xf32>, vector<16x64xf32> -> vector<16x64xf32>
    %12 = arith.addf %10, %11 : vector<16x64xf32>
    %cst_14 = arith.constant 0.000000e+00 : f32
    %13 = vector.broadcast %cst_14 : f32 to vector<16x64xf32>
    %14 = arith.maximumf %12, %13 : vector<16x64xf32>
    %15 = vector.broadcast %7 : vector<1x64xf32> to vector<16x64xf32>
    %16 = arith.addf %14, %15 : vector<16x64xf32>
    %cst_15 = arith.constant 0.000000e+00 : f32
    %17 = vector.broadcast %cst_15 : f32 to vector<16x64xf32>
    %18 = arith.subf %17, %16 : vector<16x64xf32>
    %19 = math.exp %18 : vector<16x64xf32>
    %cst_16 = arith.constant 1.000000e+00 : f32
    %20 = vector.broadcast %cst_16 : f32 to vector<16x64xf32>
    %21 = arith.addf %20, %19 : vector<16x64xf32>
    %cst_17 = arith.constant 1.000000e+00 : f32
    %22 = vector.broadcast %cst_17 : f32 to vector<16x64xf32>
    %23 = arith.divf %22, %21 : vector<16x64xf32>
    %24 = vector.extract_strided_slice %2 {offsets = [0, 4], sizes = [16, 4], strides = [1, 1]} : vector<16x8xf32> to vector<16x4xf32>
    %25 = vector.extract_strided_slice %4 {offsets = [0, 32], sizes = [16, 32], strides = [1, 1]} : vector<16x64xf32> to vector<16x32xf32>
    %cst_18 = arith.constant dense<0.000000e+00> : vector<16x64xf32>
    %26 = tpu.matmul %24, %5, %cst_18 {dimension_numbers = #tpu.dot_dimension_numbers<[1], [0], [0], [1], [0, 0, 1, 1], [], []>} : vector<16x4xf32>, vector<4x64xf32>, vector<16x64xf32> -> vector<16x64xf32>
    %cst_19 = arith.constant dense<0.000000e+00> : vector<16x64xf32>
    %27 = tpu.matmul %25, %6, %cst_19 {dimension_numbers = #tpu.dot_dimension_numbers<[1], [0], [0], [1], [0, 0, 1, 1], [], []>} : vector<16x32xf32>, vector<32x64xf32>, vector<16x64xf32> -> vector<16x64xf32>
    %28 = arith.addf %26, %27 : vector<16x64xf32>
    %cst_20 = arith.constant 0.000000e+00 : f32
    %29 = vector.broadcast %cst_20 : f32 to vector<16x64xf32>
    %30 = arith.maximumf %28, %29 : vector<16x64xf32>
    %31 = vector.broadcast %7 : vector<1x64xf32> to vector<16x64xf32>
    %32 = arith.addf %30, %31 : vector<16x64xf32>
    %cst_21 = arith.constant 0.000000e+00 : f32
    %33 = vector.broadcast %cst_21 : f32 to vector<16x64xf32>
    %34 = arith.subf %33, %32 : vector<16x64xf32>
    %35 = math.exp %34 : vector<16x64xf32>
    %cst_22 = arith.constant 1.000000e+00 : f32
    %36 = vector.broadcast %cst_22 : f32 to vector<16x64xf32>
    %37 = arith.addf %36, %35 : vector<16x64xf32>
    %cst_23 = arith.constant 1.000000e+00 : f32
    %38 = vector.broadcast %cst_23 : f32 to vector<16x64xf32>
    %39 = arith.divf %38, %37 : vector<16x64xf32>
    %40 = tpu.concatenate %23, %39 in 1 : vector<16x64xf32>, vector<16x64xf32> -> vector<16x128xf32>
    %c0_24 = arith.constant 0 : index
    %c0_25 = arith.constant 0 : index
    %41 = vector.load %arg7[%c0_24, %c0_25] : memref<16x128xf32, #tpu.memory_space<vmem>>, vector<16x128xf32>
    tpu.vector_store %arg7[%c0_24, %c0_25], %40 {strides = array<i32>} : memref<16x128xf32, #tpu.memory_space<vmem>>, vector<16x128xf32>,
    return
  }
  func.func @transform_0(%arg0: i32) -> (i32, i32) {
    %c0_i32 = arith.constant 0 : i32
    %c0_i32_0 = arith.constant 0 : i32
    return %arg0, %c0_i32 : i32, i32
  }
  func.func @transform_1(%arg0: i32) -> (i32, i32) {
    %c0_i32 = arith.constant 0 : i32
    %c0_i32_0 = arith.constant 0 : i32
    %c0_i32_1 = arith.constant 0 : i32
    return %c0_i32, %c0_i32_0 : i32, i32
  }
  func.func @transform_2(%arg0: i32) -> (i32, i32) {
    %c0_i32 = arith.constant 0 : i32
    %c0_i32_0 = arith.constant 0 : i32
    %c0_i32_1 = arith.constant 0 : i32
    return %c0_i32, %c0_i32_0 : i32, i32
  }
  func.func @transform_3(%arg0: i32) -> (i32, i32) {
    %c0_i32 = arith.constant 0 : i32
    %c0_i32_0 = arith.constant 0 : i32
    %c0_i32_1 = arith.constant 0 : i32
    return %c0_i32, %c0_i32_0 : i32, i32
  }
  func.func @transform_4(%arg0: i32) -> (i32, i32) {
    %c0_i32 = arith.constant 0 : i32
    %c0_i32_0 = arith.constant 0 : i32
    %c0_i32_1 = arith.constant 0 : i32
    return %c0_i32, %c0_i32_0 : i32, i32
  }
  func.func @transform_5(%arg0: i32) -> (i32, i32) {
    %c0_i32 = arith.constant 0 : i32
    %c0_i32_0 = arith.constant 0 : i32
    %c0_i32_1 = arith.constant 0 : i32
    return %c0_i32, %c0_i32_0 : i32, i32
  }
  func.func @transform_6(%arg0: i32) -> (i32, i32) {
    %c0_i32 = arith.constant 0 : i32
    %c0_i32_0 = arith.constant 0 : i32
    return %arg0, %c0_i32 : i32, i32
  }
}

module attributes {stable_mosaic.version = 11 : i64} {
  func.func @_spatio_conv_kernel(%arg0: i32, %arg1: memref<16x16xf32, #tpu.memory_space<vmem>>, %arg2: memref<16x8xf32, #tpu.memory_space<vmem>>, %arg3: memref<16x64xf32, #tpu.memory_space<vmem>>, %arg4: memref<4x32xf32, #tpu.memory_space<vmem>>, %arg5: memref<32x32xf32, #tpu.memory_space<vmem>>, %arg6: memref<1x32xf32, #tpu.memory_space<vmem>>, %arg7: memref<16x64xf32, #tpu.memory_space<vmem>>) attributes {dimension_semantics = [#tpu.dimension_semantics<parallel>], iteration_bounds = array<i64: 1>, scalar_prefetch = 0 : i64, scratch_operands = 0 : i64, tpu.core_type = #tpu.core_type<tc>, window_params = [{transform_indices = @transform_0, window_bounds = array<i64: 16, 16>}, {pipeline_mode = #tpu.pipeline_mode<synchronous>, transform_indices = @transform_1, window_bounds = array<i64: 16, 8>}, {pipeline_mode = #tpu.pipeline_mode<synchronous>, transform_indices = @transform_2, window_bounds = array<i64: 16, 64>}, {pipeline_mode = #tpu.pipeline_mode<synchronous>, transform_indices = @transform_3, window_bounds = array<i64: 4, 32>}, {pipeline_mode = #tpu.pipeline_mode<synchronous>, transform_indices = @transform_4, window_bounds = array<i64: 32, 32>}, {pipeline_mode = #tpu.pipeline_mode<synchronous>, transform_indices = @transform_5, window_bounds = array<i64: 1, 32>}, {transform_indices = @transform_6, window_bounds = array<i64: 16, 64>}]} {
    %c0 = arith.constant 0 : index
    %c0_0 = arith.constant 0 : index
    %0 = vector.load %arg1[%c0, %c0_0] : memref<16x16xf32, #tpu.memory_space<vmem>>, vector<16x16xf32>
    %c0_1 = arith.constant 0 : index
    %c0_2 = arith.constant 0 : index
    %1 = vector.load %arg2[%c0_1, %c0_2] : memref<16x8xf32, #tpu.memory_space<vmem>>, vector<16x8xf32>
    %cst = arith.constant dense<0.000000e+00> : vector<16x8xf32>
    %2 = tpu.matmul %0, %1, %cst {dimension_numbers = #tpu.dot_dimension_numbers<[1], [0], [0], [1], [0, 0, 1, 1], [], []>} : vector<16x16xf32>, vector<16x8xf32>, vector<16x8xf32> -> vector<16x8xf32>
    %c0_3 = arith.constant 0 : index
    %c0_4 = arith.constant 0 : index
    %3 = vector.load %arg3[%c0_3, %c0_4] : memref<16x64xf32, #tpu.memory_space<vmem>>, vector<16x64xf32>
    %cst_5 = arith.constant dense<0.000000e+00> : vector<16x64xf32>
    %4 = tpu.matmul %0, %3, %cst_5 {dimension_numbers = #tpu.dot_dimension_numbers<[1], [0], [0], [1], [0, 0, 1, 1], [], []>} : vector<16x16xf32>, vector<16x64xf32>, vector<16x64xf32> -> vector<16x64xf32>
    %c0_6 = arith.constant 0 : index
    %c0_7 = arith.constant 0 : index
    %5 = vector.load %arg4[%c0_6, %c0_7] : memref<4x32xf32, #tpu.memory_space<vmem>>, vector<4x32xf32>
    %c0_8 = arith.constant 0 : index
    %c0_9 = arith.constant 0 : index
    %6 = vector.load %arg5[%c0_8, %c0_9] : memref<32x32xf32, #tpu.memory_space<vmem>>, vector<32x32xf32>
    %c0_10 = arith.constant 0 : index
    %c0_11 = arith.constant 0 : index
    %7 = vector.load %arg6[%c0_10, %c0_11] : memref<1x32xf32, #tpu.memory_space<vmem>>, vector<1x32xf32>
    %8 = vector.extract_strided_slice %2 {offsets = [0, 0], sizes = [16, 4], strides = [1, 1]} : vector<16x8xf32> to vector<16x4xf32>
    %9 = vector.extract_strided_slice %4 {offsets = [0, 0], sizes = [16, 32], strides = [1, 1]} : vector<16x64xf32> to vector<16x32xf32>
    %cst_12 = arith.constant dense<0.000000e+00> : vector<16x32xf32>
    %10 = tpu.matmul %8, %5, %cst_12 {dimension_numbers = #tpu.dot_dimension_numbers<[1], [0], [0], [1], [0, 0, 1, 1], [], []>} : vector<16x4xf32>, vector<4x32xf32>, vector<16x32xf32> -> vector<16x32xf32>
    %cst_13 = arith.constant dense<0.000000e+00> : vector<16x32xf32>
    %11 = tpu.matmul %9, %6, %cst_13 {dimension_numbers = #tpu.dot_dimension_numbers<[1], [0], [0], [1], [0, 0, 1, 1], [], []>} : vector<16x32xf32>, vector<32x32xf32>, vector<16x32xf32> -> vector<16x32xf32>
    %12 = arith.addf %10, %11 : vector<16x32xf32>
    %cst_14 = arith.constant 0.000000e+00 : f32
    %13 = vector.broadcast %cst_14 : f32 to vector<16x32xf32>
    %14 = arith.maximumf %12, %13 : vector<16x32xf32>
    %15 = vector.broadcast %7 : vector<1x32xf32> to vector<16x32xf32>
    %16 = arith.addf %14, %15 : vector<16x32xf32>
    %17 = math.tanh %16 : vector<16x32xf32>
    %18 = vector.extract_strided_slice %2 {offsets = [0, 4], sizes = [16, 4], strides = [1, 1]} : vector<16x8xf32> to vector<16x4xf32>
    %19 = vector.extract_strided_slice %4 {offsets = [0, 32], sizes = [16, 32], strides = [1, 1]} : vector<16x64xf32> to vector<16x32xf32>
    %cst_15 = arith.constant dense<0.000000e+00> : vector<16x32xf32>
    %20 = tpu.matmul %18, %5, %cst_15 {dimension_numbers = #tpu.dot_dimension_numbers<[1], [0], [0], [1], [0, 0, 1, 1], [], []>} : vector<16x4xf32>, vector<4x32xf32>, vector<16x32xf32> -> vector<16x32xf32>
    %cst_16 = arith.constant dense<0.000000e+00> : vector<16x32xf32>
    %21 = tpu.matmul %19, %6, %cst_16 {dimension_numbers = #tpu.dot_dimension_numbers<[1], [0], [0], [1], [0, 0, 1, 1], [], []>} : vector<16x32xf32>, vector<32x32xf32>, vector<16x32xf32> -> vector<16x32xf32>
    %22 = arith.addf %20, %21 : vector<16x32xf32>
    %cst_17 = arith.constant 0.000000e+00 : f32
    %23 = vector.broadcast %cst_17 : f32 to vector<16x32xf32>
    %24 = arith.maximumf %22, %23 : vector<16x32xf32>
    %25 = vector.broadcast %7 : vector<1x32xf32> to vector<16x32xf32>
    %26 = arith.addf %24, %25 : vector<16x32xf32>
    %27 = math.tanh %26 : vector<16x32xf32>
    %28 = tpu.concatenate %17, %27 in 1 : vector<16x32xf32>, vector<16x32xf32> -> vector<16x64xf32>
    %c0_18 = arith.constant 0 : index
    %c0_19 = arith.constant 0 : index
    %29 = vector.load %arg7[%c0_18, %c0_19] : memref<16x64xf32, #tpu.memory_space<vmem>>, vector<16x64xf32>
    tpu.vector_store %arg7[%c0_18, %c0_19], %28 {strides = array<i32>} : memref<16x64xf32, #tpu.memory_space<vmem>>, vector<16x64xf32>,
    return
  }
  func.func @transform_0(%arg0: i32) -> (i32, i32) {
    %c0_i32 = arith.constant 0 : i32
    %c0_i32_0 = arith.constant 0 : i32
    return %arg0, %c0_i32 : i32, i32
  }
  func.func @transform_1(%arg0: i32) -> (i32, i32) {
    %c0_i32 = arith.constant 0 : i32
    %c0_i32_0 = arith.constant 0 : i32
    %c0_i32_1 = arith.constant 0 : i32
    return %c0_i32, %c0_i32_0 : i32, i32
  }
  func.func @transform_2(%arg0: i32) -> (i32, i32) {
    %c0_i32 = arith.constant 0 : i32
    %c0_i32_0 = arith.constant 0 : i32
    %c0_i32_1 = arith.constant 0 : i32
    return %c0_i32, %c0_i32_0 : i32, i32
  }
  func.func @transform_3(%arg0: i32) -> (i32, i32) {
    %c0_i32 = arith.constant 0 : i32
    %c0_i32_0 = arith.constant 0 : i32
    %c0_i32_1 = arith.constant 0 : i32
    return %c0_i32, %c0_i32_0 : i32, i32
  }
  func.func @transform_4(%arg0: i32) -> (i32, i32) {
    %c0_i32 = arith.constant 0 : i32
    %c0_i32_0 = arith.constant 0 : i32
    %c0_i32_1 = arith.constant 0 : i32
    return %c0_i32, %c0_i32_0 : i32, i32
  }
  func.func @transform_5(%arg0: i32) -> (i32, i32) {
    %c0_i32 = arith.constant 0 : i32
    %c0_i32_0 = arith.constant 0 : i32
    %c0_i32_1 = arith.constant 0 : i32
    return %c0_i32, %c0_i32_0 : i32, i32
  }
  func.func @transform_6(%arg0: i32) -> (i32, i32) {
    %c0_i32 = arith.constant 0 : i32
    %c0_i32_0 = arith.constant 0 : i32
    return %arg0, %c0_i32 : i32, i32
  }
}

module attributes {stable_mosaic.version = 11 : i64} {
  func.func @_spatio_conv_kernel(%arg0: i32, %arg1: memref<16x16xf32, #tpu.memory_space<vmem>>, %arg2: memref<16x64xf32, #tpu.memory_space<vmem>>, %arg3: memref<16x64xf32, #tpu.memory_space<vmem>>, %arg4: memref<32x64xf32, #tpu.memory_space<vmem>>, %arg5: memref<32x64xf32, #tpu.memory_space<vmem>>, %arg6: memref<1x64xf32, #tpu.memory_space<vmem>>, %arg7: memref<16x128xf32, #tpu.memory_space<vmem>>) attributes {dimension_semantics = [#tpu.dimension_semantics<parallel>], iteration_bounds = array<i64: 1>, scalar_prefetch = 0 : i64, scratch_operands = 0 : i64, tpu.core_type = #tpu.core_type<tc>, window_params = [{transform_indices = @transform_0, window_bounds = array<i64: 16, 16>}, {pipeline_mode = #tpu.pipeline_mode<synchronous>, transform_indices = @transform_1, window_bounds = array<i64: 16, 64>}, {pipeline_mode = #tpu.pipeline_mode<synchronous>, transform_indices = @transform_2, window_bounds = array<i64: 16, 64>}, {pipeline_mode = #tpu.pipeline_mode<synchronous>, transform_indices = @transform_3, window_bounds = array<i64: 32, 64>}, {pipeline_mode = #tpu.pipeline_mode<synchronous>, transform_indices = @transform_4, window_bounds = array<i64: 32, 64>}, {pipeline_mode = #tpu.pipeline_mode<synchronous>, transform_indices = @transform_5, window_bounds = array<i64: 1, 64>}, {transform_indices = @transform_6, window_bounds = array<i64: 16, 128>}]} {
    %c0 = arith.constant 0 : index
    %c0_0 = arith.constant 0 : index
    %0 = vector.load %arg1[%c0, %c0_0] : memref<16x16xf32, #tpu.memory_space<vmem>>, vector<16x16xf32>
    %c0_1 = arith.constant 0 : index
    %c0_2 = arith.constant 0 : index
    %1 = vector.load %arg2[%c0_1, %c0_2] : memref<16x64xf32, #tpu.memory_space<vmem>>, vector<16x64xf32>
    %cst = arith.constant dense<0.000000e+00> : vector<16x64xf32>
    %2 = tpu.matmul %0, %1, %cst {dimension_numbers = #tpu.dot_dimension_numbers<[1], [0], [0], [1], [0, 0, 1, 1], [], []>} : vector<16x16xf32>, vector<16x64xf32>, vector<16x64xf32> -> vector<16x64xf32>
    %c0_3 = arith.constant 0 : index
    %c0_4 = arith.constant 0 : index
    %3 = vector.load %arg3[%c0_3, %c0_4] : memref<16x64xf32, #tpu.memory_space<vmem>>, vector<16x64xf32>
    %cst_5 = arith.constant dense<0.000000e+00> : vector<16x64xf32>
    %4 = tpu.matmul %0, %3, %cst_5 {dimension_numbers = #tpu.dot_dimension_numbers<[1], [0], [0], [1], [0, 0, 1, 1], [], []>} : vector<16x16xf32>, vector<16x64xf32>, vector<16x64xf32> -> vector<16x64xf32>
    %c0_6 = arith.constant 0 : index
    %c0_7 = arith.constant 0 : index
    %5 = vector.load %arg4[%c0_6, %c0_7] : memref<32x64xf32, #tpu.memory_space<vmem>>, vector<32x64xf32>
    %c0_8 = arith.constant 0 : index
    %c0_9 = arith.constant 0 : index
    %6 = vector.load %arg5[%c0_8, %c0_9] : memref<32x64xf32, #tpu.memory_space<vmem>>, vector<32x64xf32>
    %c0_10 = arith.constant 0 : index
    %c0_11 = arith.constant 0 : index
    %7 = vector.load %arg6[%c0_10, %c0_11] : memref<1x64xf32, #tpu.memory_space<vmem>>, vector<1x64xf32>
    %8 = vector.extract_strided_slice %2 {offsets = [0, 0], sizes = [16, 32], strides = [1, 1]} : vector<16x64xf32> to vector<16x32xf32>
    %9 = vector.extract_strided_slice %4 {offsets = [0, 0], sizes = [16, 32], strides = [1, 1]} : vector<16x64xf32> to vector<16x32xf32>
    %cst_12 = arith.constant dense<0.000000e+00> : vector<16x64xf32>
    %10 = tpu.matmul %8, %5, %cst_12 {dimension_numbers = #tpu.dot_dimension_numbers<[1], [0], [0], [1], [0, 0, 1, 1], [], []>} : vector<16x32xf32>, vector<32x64xf32>, vector<16x64xf32> -> vector<16x64xf32>
    %cst_13 = arith.constant dense<0.000000e+00> : vector<16x64xf32>
    %11 = tpu.matmul %9, %6, %cst_13 {dimension_numbers = #tpu.dot_dimension_numbers<[1], [0], [0], [1], [0, 0, 1, 1], [], []>} : vector<16x32xf32>, vector<32x64xf32>, vector<16x64xf32> -> vector<16x64xf32>
    %12 = arith.addf %10, %11 : vector<16x64xf32>
    %cst_14 = arith.constant 0.000000e+00 : f32
    %13 = vector.broadcast %cst_14 : f32 to vector<16x64xf32>
    %14 = arith.maximumf %12, %13 : vector<16x64xf32>
    %15 = vector.broadcast %7 : vector<1x64xf32> to vector<16x64xf32>
    %16 = arith.addf %14, %15 : vector<16x64xf32>
    %cst_15 = arith.constant 0.000000e+00 : f32
    %17 = vector.broadcast %cst_15 : f32 to vector<16x64xf32>
    %18 = arith.subf %17, %16 : vector<16x64xf32>
    %19 = math.exp %18 : vector<16x64xf32>
    %cst_16 = arith.constant 1.000000e+00 : f32
    %20 = vector.broadcast %cst_16 : f32 to vector<16x64xf32>
    %21 = arith.addf %20, %19 : vector<16x64xf32>
    %cst_17 = arith.constant 1.000000e+00 : f32
    %22 = vector.broadcast %cst_17 : f32 to vector<16x64xf32>
    %23 = arith.divf %22, %21 : vector<16x64xf32>
    %24 = vector.extract_strided_slice %2 {offsets = [0, 32], sizes = [16, 32], strides = [1, 1]} : vector<16x64xf32> to vector<16x32xf32>
    %25 = vector.extract_strided_slice %4 {offsets = [0, 32], sizes = [16, 32], strides = [1, 1]} : vector<16x64xf32> to vector<16x32xf32>
    %cst_18 = arith.constant dense<0.000000e+00> : vector<16x64xf32>
    %26 = tpu.matmul %24, %5, %cst_18 {dimension_numbers = #tpu.dot_dimension_numbers<[1], [0], [0], [1], [0, 0, 1, 1], [], []>} : vector<16x32xf32>, vector<32x64xf32>, vector<16x64xf32> -> vector<16x64xf32>
    %cst_19 = arith.constant dense<0.000000e+00> : vector<16x64xf32>
    %27 = tpu.matmul %25, %6, %cst_19 {dimension_numbers = #tpu.dot_dimension_numbers<[1], [0], [0], [1], [0, 0, 1, 1], [], []>} : vector<16x32xf32>, vector<32x64xf32>, vector<16x64xf32> -> vector<16x64xf32>
    %28 = arith.addf %26, %27 : vector<16x64xf32>
    %cst_20 = arith.constant 0.000000e+00 : f32
    %29 = vector.broadcast %cst_20 : f32 to vector<16x64xf32>
    %30 = arith.maximumf %28, %29 : vector<16x64xf32>
    %31 = vector.broadcast %7 : vector<1x64xf32> to vector<16x64xf32>
    %32 = arith.addf %30, %31 : vector<16x64xf32>
    %cst_21 = arith.constant 0.000000e+00 : f32
    %33 = vector.broadcast %cst_21 : f32 to vector<16x64xf32>
    %34 = arith.subf %33, %32 : vector<16x64xf32>
    %35 = math.exp %34 : vector<16x64xf32>
    %cst_22 = arith.constant 1.000000e+00 : f32
    %36 = vector.broadcast %cst_22 : f32 to vector<16x64xf32>
    %37 = arith.addf %36, %35 : vector<16x64xf32>
    %cst_23 = arith.constant 1.000000e+00 : f32
    %38 = vector.broadcast %cst_23 : f32 to vector<16x64xf32>
    %39 = arith.divf %38, %37 : vector<16x64xf32>
    %40 = tpu.concatenate %23, %39 in 1 : vector<16x64xf32>, vector<16x64xf32> -> vector<16x128xf32>
    %c0_24 = arith.constant 0 : index
    %c0_25 = arith.constant 0 : index
    %41 = vector.load %arg7[%c0_24, %c0_25] : memref<16x128xf32, #tpu.memory_space<vmem>>, vector<16x128xf32>
    tpu.vector_store %arg7[%c0_24, %c0_25], %40 {strides = array<i32>} : memref<16x128xf32, #tpu.memory_space<vmem>>, vector<16x128xf32>,
    return
  }
  func.func @transform_0(%arg0: i32) -> (i32, i32) {
    %c0_i32 = arith.constant 0 : i32
    %c0_i32_0 = arith.constant 0 : i32
    return %arg0, %c0_i32 : i32, i32
  }
  func.func @transform_1(%arg0: i32) -> (i32, i32) {
    %c0_i32 = arith.constant 0 : i32
    %c0_i32_0 = arith.constant 0 : i32
    %c0_i32_1 = arith.constant 0 : i32
    return %c0_i32, %c0_i32_0 : i32, i32
  }
  func.func @transform_2(%arg0: i32) -> (i32, i32) {
    %c0_i32 = arith.constant 0 : i32
    %c0_i32_0 = arith.constant 0 : i32
    %c0_i32_1 = arith.constant 0 : i32
    return %c0_i32, %c0_i32_0 : i32, i32
  }
  func.func @transform_3(%arg0: i32) -> (i32, i32) {
    %c0_i32 = arith.constant 0 : i32
    %c0_i32_0 = arith.constant 0 : i32
    %c0_i32_1 = arith.constant 0 : i32
    return %c0_i32, %c0_i32_0 : i32, i32
  }
  func.func @transform_4(%arg0: i32) -> (i32, i32) {
    %c0_i32 = arith.constant 0 : i32
    %c0_i32_0 = arith.constant 0 : i32
    %c0_i32_1 = arith.constant 0 : i32
    return %c0_i32, %c0_i32_0 : i32, i32
  }
  func.func @transform_5(%arg0: i32) -> (i32, i32) {
    %c0_i32 = arith.constant 0 : i32
    %c0_i32_0 = arith.constant 0 : i32
    %c0_i32_1 = arith.constant 0 : i32
    return %c0_i32, %c0_i32_0 : i32, i32
  }
  func.func @transform_6(%arg0: i32) -> (i32, i32) {
    %c0_i32 = arith.constant 0 : i32
    %c0_i32_0 = arith.constant 0 : i32
    return %arg0, %c0_i32 : i32, i32
  }
}

module attributes {stable_mosaic.version = 11 : i64} {
  func.func @_spatio_conv_kernel(%arg0: i32, %arg1: memref<16x16xf32, #tpu.memory_space<vmem>>, %arg2: memref<16x64xf32, #tpu.memory_space<vmem>>, %arg3: memref<16x64xf32, #tpu.memory_space<vmem>>, %arg4: memref<32x32xf32, #tpu.memory_space<vmem>>, %arg5: memref<32x32xf32, #tpu.memory_space<vmem>>, %arg6: memref<1x32xf32, #tpu.memory_space<vmem>>, %arg7: memref<16x64xf32, #tpu.memory_space<vmem>>) attributes {dimension_semantics = [#tpu.dimension_semantics<parallel>], iteration_bounds = array<i64: 1>, scalar_prefetch = 0 : i64, scratch_operands = 0 : i64, tpu.core_type = #tpu.core_type<tc>, window_params = [{transform_indices = @transform_0, window_bounds = array<i64: 16, 16>}, {pipeline_mode = #tpu.pipeline_mode<synchronous>, transform_indices = @transform_1, window_bounds = array<i64: 16, 64>}, {pipeline_mode = #tpu.pipeline_mode<synchronous>, transform_indices = @transform_2, window_bounds = array<i64: 16, 64>}, {pipeline_mode = #tpu.pipeline_mode<synchronous>, transform_indices = @transform_3, window_bounds = array<i64: 32, 32>}, {pipeline_mode = #tpu.pipeline_mode<synchronous>, transform_indices = @transform_4, window_bounds = array<i64: 32, 32>}, {pipeline_mode = #tpu.pipeline_mode<synchronous>, transform_indices = @transform_5, window_bounds = array<i64: 1, 32>}, {transform_indices = @transform_6, window_bounds = array<i64: 16, 64>}]} {
    %c0 = arith.constant 0 : index
    %c0_0 = arith.constant 0 : index
    %0 = vector.load %arg1[%c0, %c0_0] : memref<16x16xf32, #tpu.memory_space<vmem>>, vector<16x16xf32>
    %c0_1 = arith.constant 0 : index
    %c0_2 = arith.constant 0 : index
    %1 = vector.load %arg2[%c0_1, %c0_2] : memref<16x64xf32, #tpu.memory_space<vmem>>, vector<16x64xf32>
    %cst = arith.constant dense<0.000000e+00> : vector<16x64xf32>
    %2 = tpu.matmul %0, %1, %cst {dimension_numbers = #tpu.dot_dimension_numbers<[1], [0], [0], [1], [0, 0, 1, 1], [], []>} : vector<16x16xf32>, vector<16x64xf32>, vector<16x64xf32> -> vector<16x64xf32>
    %c0_3 = arith.constant 0 : index
    %c0_4 = arith.constant 0 : index
    %3 = vector.load %arg3[%c0_3, %c0_4] : memref<16x64xf32, #tpu.memory_space<vmem>>, vector<16x64xf32>
    %cst_5 = arith.constant dense<0.000000e+00> : vector<16x64xf32>
    %4 = tpu.matmul %0, %3, %cst_5 {dimension_numbers = #tpu.dot_dimension_numbers<[1], [0], [0], [1], [0, 0, 1, 1], [], []>} : vector<16x16xf32>, vector<16x64xf32>, vector<16x64xf32> -> vector<16x64xf32>
    %c0_6 = arith.constant 0 : index
    %c0_7 = arith.constant 0 : index
    %5 = vector.load %arg4[%c0_6, %c0_7] : memref<32x32xf32, #tpu.memory_space<vmem>>, vector<32x32xf32>
    %c0_8 = arith.constant 0 : index
    %c0_9 = arith.constant 0 : index
    %6 = vector.load %arg5[%c0_8, %c0_9] : memref<32x32xf32, #tpu.memory_space<vmem>>, vector<32x32xf32>
    %c0_10 = arith.constant 0 : index
    %c0_11 = arith.constant 0 : index
    %7 = vector.load %arg6[%c0_10, %c0_11] : memref<1x32xf32, #tpu.memory_space<vmem>>, vector<1x32xf32>
    %8 = vector.extract_strided_slice %2 {offsets = [0, 0], sizes = [16, 32], strides = [1, 1]} : vector<16x64xf32> to vector<16x32xf32>
    %9 = vector.extract_strided_slice %4 {offsets = [0, 0], sizes = [16, 32], strides = [1, 1]} : vector<16x64xf32> to vector<16x32xf32>
    %cst_12 = arith.constant dense<0.000000e+00> : vector<16x32xf32>
    %10 = tpu.matmul %8, %5, %cst_12 {dimension_numbers = #tpu.dot_dimension_numbers<[1], [0], [0], [1], [0, 0, 1, 1], [], []>} : vector<16x32xf32>, vector<32x32xf32>, vector<16x32xf32> -> vector<16x32xf32>
    %cst_13 = arith.constant dense<0.000000e+00> : vector<16x32xf32>
    %11 = tpu.matmul %9, %6, %cst_13 {dimension_numbers = #tpu.dot_dimension_numbers<[1], [0], [0], [1], [0, 0, 1, 1], [], []>} : vector<16x32xf32>, vector<32x32xf32>, vector<16x32xf32> -> vector<16x32xf32>
    %12 = arith.addf %10, %11 : vector<16x32xf32>
    %cst_14 = arith.constant 0.000000e+00 : f32
    %13 = vector.broadcast %cst_14 : f32 to vector<16x32xf32>
    %14 = arith.maximumf %12, %13 : vector<16x32xf32>
    %15 = vector.broadcast %7 : vector<1x32xf32> to vector<16x32xf32>
    %16 = arith.addf %14, %15 : vector<16x32xf32>
    %17 = math.tanh %16 : vector<16x32xf32>
    %18 = vector.extract_strided_slice %2 {offsets = [0, 32], sizes = [16, 32], strides = [1, 1]} : vector<16x64xf32> to vector<16x32xf32>
    %19 = vector.extract_strided_slice %4 {offsets = [0, 32], sizes = [16, 32], strides = [1, 1]} : vector<16x64xf32> to vector<16x32xf32>
    %cst_15 = arith.constant dense<0.000000e+00> : vector<16x32xf32>
    %20 = tpu.matmul %18, %5, %cst_15 {dimension_numbers = #tpu.dot_dimension_numbers<[1], [0], [0], [1], [0, 0, 1, 1], [], []>} : vector<16x32xf32>, vector<32x32xf32>, vector<16x32xf32> -> vector<16x32xf32>
    %cst_16 = arith.constant dense<0.000000e+00> : vector<16x32xf32>
    %21 = tpu.matmul %19, %6, %cst_16 {dimension_numbers = #tpu.dot_dimension_numbers<[1], [0], [0], [1], [0, 0, 1, 1], [], []>} : vector<16x32xf32>, vector<32x32xf32>, vector<16x32xf32> -> vector<16x32xf32>
    %22 = arith.addf %20, %21 : vector<16x32xf32>
    %cst_17 = arith.constant 0.000000e+00 : f32
    %23 = vector.broadcast %cst_17 : f32 to vector<16x32xf32>
    %24 = arith.maximumf %22, %23 : vector<16x32xf32>
    %25 = vector.broadcast %7 : vector<1x32xf32> to vector<16x32xf32>
    %26 = arith.addf %24, %25 : vector<16x32xf32>
    %27 = math.tanh %26 : vector<16x32xf32>
    %28 = tpu.concatenate %17, %27 in 1 : vector<16x32xf32>, vector<16x32xf32> -> vector<16x64xf32>
    %c0_18 = arith.constant 0 : index
    %c0_19 = arith.constant 0 : index
    %29 = vector.load %arg7[%c0_18, %c0_19] : memref<16x64xf32, #tpu.memory_space<vmem>>, vector<16x64xf32>
    tpu.vector_store %arg7[%c0_18, %c0_19], %28 {strides = array<i32>} : memref<16x64xf32, #tpu.memory_space<vmem>>, vector<16x64xf32>,
    return
  }
  func.func @transform_0(%arg0: i32) -> (i32, i32) {
    %c0_i32 = arith.constant 0 : i32
    %c0_i32_0 = arith.constant 0 : i32
    return %arg0, %c0_i32 : i32, i32
  }
  func.func @transform_1(%arg0: i32) -> (i32, i32) {
    %c0_i32 = arith.constant 0 : i32
    %c0_i32_0 = arith.constant 0 : i32
    %c0_i32_1 = arith.constant 0 : i32
    return %c0_i32, %c0_i32_0 : i32, i32
  }
  func.func @transform_2(%arg0: i32) -> (i32, i32) {
    %c0_i32 = arith.constant 0 : i32
    %c0_i32_0 = arith.constant 0 : i32
    %c0_i32_1 = arith.constant 0 : i32
    return %c0_i32, %c0_i32_0 : i32, i32
  }
  func.func @transform_3(%arg0: i32) -> (i32, i32) {
    %c0_i32 = arith.constant 0 : i32
    %c0_i32_0 = arith.constant 0 : i32
    %c0_i32_1 = arith.constant 0 : i32
    return %c0_i32, %c0_i32_0 : i32, i32
  }
  func.func @transform_4(%arg0: i32) -> (i32, i32) {
    %c0_i32 = arith.constant 0 : i32
    %c0_i32_0 = arith.constant 0 : i32
    %c0_i32_1 = arith.constant 0 : i32
    return %c0_i32, %c0_i32_0 : i32, i32
  }
  func.func @transform_5(%arg0: i32) -> (i32, i32) {
    %c0_i32 = arith.constant 0 : i32
    %c0_i32_0 = arith.constant 0 : i32
    %c0_i32_1 = arith.constant 0 : i32
    return %c0_i32, %c0_i32_0 : i32, i32
  }
  func.func @transform_6(%arg0: i32) -> (i32, i32) {
    %c0_i32 = arith.constant 0 : i32
    %c0_i32_0 = arith.constant 0 : i32
    return %arg0, %c0_i32 : i32, i32
  }
}

</mosaic_0001>

<bundles_post_ra>
// kernel: encoder_forward.4
= control target key start
LH: loop header
LB: loop body
LE: loop exit
PB: predicated region body
PF: predicated region fallthrough
CT: control target
= control target key end

     0   :  { %vm27_vm0 = vcmask 130048   ;;  %vm281_vm1 = vcmask 1043456   ;;  %vm192_vm2 = vcmask 261120   ;;  %vm274_vm3 = vcmask 31744   ;;  %s716_s16 = smov 124   ;;  %s717_s18 = smov 64   ;;  %s811_s2 = inlined_call_operand.vmem [shape: f32[16,64], index: 2, kind: input, shape index: {}]   ;;  %s812_s1 = inlined_call_operand.vmem [shape: f32[16,8], index: 1, kind: input, shape index: {}]   ;;  %s813_s0 = inlined_call_operand.vmem [shape: f32[16,16], index: 0, kind: input, shape index: {}]   ;;  %s814_s4 = inlined_call_operand.vmem [shape: f32[32,64], index: 4, kind: input, shape index: {}]   ;;  %s815_s3 = inlined_call_operand.vmem [shape: f32[4,64], index: 3, kind: input, shape index: {}]   ;;  %s816_s5 = inlined_call_operand.vmem [shape: f32[1,64], index: 5, kind: input, shape index: {}]   ;;  %s817_s6 = inlined_call_operand.vmem [shape: f32[16,128], index: 6, kind: output, shape index: {}]  }
   0x1   :  { %v109_v0 = vld [vmem:[%s811_s2] sm:$0xff]  ;;  %v110_v1 = vld [vmem:[%s811_s2 + $0x8] sm:$0xff]  ;;  %v189_v10 = vld [vmem:[%s814_s4 + $0x10] sm:$0xff]  ;;  %vm572_vm4 = vcmask 523264  }
   0x2   :  { %v25_v2 = vld [vmem:[%s812_s1] sm:$0xff]  ;;  %v672_v3 = vpack.c.bf16 %v110_v1, %v109_v0  ;;  %v26_v4 = vld [vmem:[%s812_s1 + $0x8] sm:$0xff]  ;;  %v190_v11 = vld [vmem:[%s814_s4 + $0x18] sm:$0xff] }
   0x3   :  { %v23_v5 = vld [vmem:[%s813_s0] sm:$0xff]  ;;  %v668_v6 = vpack.c.bf16 %v26_v4, %v25_v2  ;;  %v188_v8 = vld [vmem:[%s814_s4 + $0x8] sm:$0xff]  ;;  %v680_v13 = vpack.c.bf16 %v190_v11, %v189_v10 }
   0x4   :  { %633 = vmatprep.mubr.msk.f32.mxu1 %vm27_vm0, %v23_v5  ;;  %626 = vmatprep.mubr.msk.f32.mxu0 %vm27_vm0, %v23_v5  ;;  %v187_v7 = vld [vmem:[%s814_s4] sm:$0xff]  ;;  %v24_v12 = vld [vmem:[%s813_s0 + $0x8] sm:$0xff]  ;;  %s715_s0 = smov 96  }
   0x5   :  { %673 = vmatprep.subr.bf16.mxu1 %v672_v3  ;;  %v676_v9 = vpack.c.bf16 %v188_v8, %v187_v7  ;;  %669 = vmatprep.subr.bf16.mxu0 %v668_v6  ;;  %v186_v14 = vld [vmem:[%s815_s3] sm:$0xf] }
   0x6   :  { %675 = vmatpush3.bf16.msra.mxu1 %v672_v3  ;;  %671 = vmatpush3.bf16.msra.mxu0 %v668_v6  ;;  %v590_v28 = vld [vmem:[%s816_s5] ss:$0 sm:$0xff] }
   0x7   :  { %685 = vmatprep.subr.bf16.mxu1 %v676_v9  ;;  %677 = vmatprep.subr.bf16.mxu0 %v676_v9 }
   0x9   :  { %634 = vmatmul.mubr.msk.f32.vlgmr.msra.gmra.mrb[0].mxu1 %vm27_vm0, %v24_v12  ;;  %627 = vmatmul.mubr.msk.f32.vlgmr.msra.gmra.mrb[0].mxu0 %vm27_vm0, %v24_v12 }
   0xa   :  { %687 = vmatpush3.bf16.msra.mxu1 %v676_v9  ;;  %679 = vmatpush3.bf16.msra.mxu0 %v676_v9 }
   0xb   :  { %689 = vmatprep.subr.bf16.mxu1 %v680_v13  ;;  %681 = vmatprep.subr.bf16.mxu0 %v680_v13 }
   0xe   :  { %691 = vmatpush3.bf16.msra.mxu1 %v680_v13  ;;  %683 = vmatpush3.bf16.msra.mxu0 %v680_v13 }
   0xf   :  { %647 = vmatprep.subr.msk.mxu0 %vm281_vm1, %v186_v14  ;;  %663 = vmatprep.subr.msk.mxu1 %vm281_vm1, %v186_v14 }
  0xdc   :  { %v635_v15 = vpop.f32.mrb[0].mxu1  ;;  %v628_v17 = vpop.f32.mrb[0].mxu0 }
  0xdd   :  { %v177_v16 = vpop.f32.mrb[1].mxu1  ;;  %v100_v18 = vpop.f32.mrb[1].mxu0 }
  0xde   :  { %382 = vrot.lane.b32.xlu0 %v177_v16, %s715_s0  ;;  %644 = vmatprep.mubr.msk.f32.mxu0 %vm192_vm2, %v177_v16 }
  0xdf   :  { %645 = vmatmul.mubr.msk.f32.vlgmr.msra.gmra.mrb[2].mxu0 %vm192_vm2, %v635_v15  ;;  %465 = vrot.lane.b32.xlu1 %v100_v18, %s716_s16 }
  0xe0   :  { %649 = vmatprep.mubr.msk.f32.mxu0 %vm274_vm3, %v100_v18  ;;  %648 = vmatpush3.msk.msra.mxu0 %vm281_vm1, %v186_v14 }
  0xe2   :  { %384 = vrot.lane.b32.xlu0 %v635_v15, %s715_s0 }
  0xe3   :  { %467 = vrot.lane.b32.xlu1 %v628_v17, %s716_s16 }
  0xe7   :  { %650 = vmatmul.mubr.msk.f32.vlgmr.msra.gmra.mrb[2].mxu0 %vm274_vm3, %v628_v17 }
 0x150   :  { %v383_v19 = vpop.permute.xlu0 %382 }
 0x151   :  { %660 = vmatprep.mubr.msk.f32.mxu1 %vm192_vm2, %v383_v19  ;;  %v466_v21 = vpop.permute.xlu1 %465 }
 0x154   :  { %v385_v20 = vpop.permute.xlu0 %384 }
 0x155   :  { %661 = vmatmul.mubr.msk.f32.vlgmr.msra.gmra.mrb[2].mxu1 %vm192_vm2, %v385_v20  ;;  %v468_v22 = vpop.permute.xlu1 %467 }
 0x156   :  { %664 = vmatpush3.msk.msra.mxu1 %vm281_vm1, %v186_v14  ;;  %665 = vmatprep.mubr.msk.f32.mxu1 %vm274_vm3, %v466_v21 }
 0x15d   :  { %666 = vmatmul.mubr.msk.f32.vlgmr.msra.gmra.mrb[2].mxu1 %vm274_vm3, %v468_v22 }
 0x1ba   :  { %v651_v23 = vpop.f32.mrb[2].mxu0 }
 0x1bb   :  { %v351_v24 = vpop.f32.mrb[3].mxu0  ;;  %v361_v42 = vmax.f32 %v651_v23, 0.0 }
 0x1bc   :  { %v360_v43 = vmax.f32 %v351_v24, 0.0 }
 0x1bd   :  { %v369_v44 = vadd.f32 %v590_v28, %v361_v42 }
 0x1be   :  { %v368_v45 = vadd.f32 %v590_v28, %v360_v43 }
 0x1bf   :  { %v371_v46 = vsub.f32 0.0, %v369_v44 }
 0x1c0   :  { %v370_v47 = vsub.f32 0.0, %v368_v45 }
 0x1c1   :  { %v374_v48 = vmul.f32 1.442695, %v371_v46 }
 0x1c2   :  { %v372_v49 = vmul.f32 1.442695, %v370_v47 }
 0x230   :  { %v667_v25 = vpop.f32.mrb[2].mxu1 }
 0x231   :  { %v549_v26 = vmax.f32 %v667_v25, 0.0  ;;  %v539_v27 = vpop.f32.mrb[3].mxu1 }
 0x232   :  { %v548_v29 = vmax.f32 %v539_v27, 0.0 }
 0x233   :  { %v551_v30 = vadd.f32 %v590_v28, %v549_v26 }
 0x234   :  { %v550_v31 = vadd.f32 %v590_v28, %v548_v29 }
 0x235   :  { %v553_v32 = vsub.f32 0.0, %v551_v30 }
 0x236   :  { %v552_v33 = vsub.f32 0.0, %v550_v31 }
 0x237   :  { %v556_v34 = vmul.f32 1.442695, %v553_v32 }
 0x238   :  { %v554_v35 = vmul.f32 1.442695, %v552_v33 }
 0x239   :  { %699 = vpow2.f32 %v556_v34 }
 0x23a   :  { %701 = vpow2.f32 %v554_v35 }
 0x243   :  { %v700_v36 = vpop.eup %699 }
 0x244   :  { %v702_v37 = vpop.eup %701  ;;  %v559_v38 = vadd.f32 1.0, %v700_v36 }
 0x245   :  { %v558_v39 = vadd.f32 1.0, %v702_v37 }
 0x246   :  { %703 = vrcp.f32 %v559_v38 }
 0x247   :  { %705 = vrcp.f32 %v558_v39 }
 0x248   :  { %707 = vpow2.f32 %v374_v48 }
 0x249   :  { %709 = vpow2.f32 %v372_v49 }
 0x250   :  { %v704_v40 = vpop.eup %703 }
 0x251   :  { %v706_v41 = vpop.eup %705  ;;  %568 = vrot.lane.b32.xlu1 %v704_v40, %s717_s18 }
 0x252   :  { %566 = vrot.lane.b32.xlu0 %v706_v41, %s717_s18  ;;  %v708_v50 = vpop.eup %707 }
 0x253   :  { %v710_v51 = vpop.eup %709  ;;  %v377_v52 = vadd.f32 1.0, %v708_v50 }
 0x254   :  { %v376_v53 = vadd.f32 1.0, %v710_v51 }
 0x255   :  { %711 = vrcp.f32 %v377_v52 }
 0x256   :  { %713 = vrcp.f32 %v376_v53 }
 0x25f   :  { %v712_v54 = vpop.eup %711 }
 0x260   :  { %v714_v56 = vpop.eup %713 }
 0x2c3   :  { %v569_v55 = vpop.permute.xlu1 %568 }
 0x2c4   :  { %v574_v57 = vsel %vm572_vm4, %v712_v54, %v569_v55  ;;  %v567_v58 = vpop.permute.xlu0 %566 }
 0x2c5   :  { %576 = vst [vmem:[%s817_s6 + $0x8] sm:$0xff] %v574_v57  ;;  %v573_v59 = vsel %vm572_vm4, %v714_v56, %v567_v58 }
 0x2c6   :  { %575 = vst [vmem:[%s817_s6] sm:$0xff] %v573_v59 }

// kernel: encoder_forward.5
= control target key start
LH: loop header
LB: loop body
LE: loop exit
PB: predicated region body
PF: predicated region fallthrough
CT: control target
= control target key end

     0   :  { %vm27_vm0 = vcmask 130048   ;;  %vm281_vm1 = vcmask 1043456   ;;  %vm192_vm2 = vcmask 261120   ;;  %vm274_vm3 = vcmask 31744   ;;  %s688_s16 = smov 124   ;;  %s689_s18 = smov 32   ;;  %s785_s2 = inlined_call_operand.vmem [shape: f32[16,64], index: 2, kind: input, shape index: {}]   ;;  %s786_s1 = inlined_call_operand.vmem [shape: f32[16,8], index: 1, kind: input, shape index: {}]   ;;  %s787_s0 = inlined_call_operand.vmem [shape: f32[16,16], index: 0, kind: input, shape index: {}]   ;;  %s788_s4 = inlined_call_operand.vmem [shape: f32[32,32], index: 4, kind: input, shape index: {}]   ;;  %s789_s3 = inlined_call_operand.vmem [shape: f32[4,32], index: 3, kind: input, shape index: {}]   ;;  %s790_s5 = inlined_call_operand.vmem [shape: f32[1,32], index: 5, kind: input, shape index: {}]   ;;  %s791_s6 = inlined_call_operand.vmem [shape: f32[16,64], index: 6, kind: output, shape index: {}]  }
   0x1   :  { %v109_v0 = vld [vmem:[%s785_s2] sm:$0xff]  ;;  %v110_v1 = vld [vmem:[%s785_s2 + $0x8] sm:$0xff]  ;;  %v189_v10 = vld [vmem:[%s788_s4 + $0x10] sm:$0xff]  ;;  %vm554_vm4 = vcmask 523264  }
   0x2   :  { %v25_v2 = vld [vmem:[%s786_s1] sm:$0xff]  ;;  %v652_v3 = vpack.c.bf16 %v110_v1, %v109_v0  ;;  %v26_v4 = vld [vmem:[%s786_s1 + $0x8] sm:$0xff]  ;;  %v190_v11 = vld [vmem:[%s788_s4 + $0x18] sm:$0xff] }
   0x3   :  { %v23_v5 = vld [vmem:[%s787_s0] sm:$0xff]  ;;  %v648_v6 = vpack.c.bf16 %v26_v4, %v25_v2  ;;  %v188_v8 = vld [vmem:[%s788_s4 + $0x8] sm:$0xff]  ;;  %v660_v13 = vpack.c.bf16 %v190_v11, %v189_v10 }
   0x4   :  { %613 = vmatprep.mubr.msk.f32.mxu1 %vm27_vm0, %v23_v5  ;;  %606 = vmatprep.mubr.msk.f32.mxu0 %vm27_vm0, %v23_v5  ;;  %v187_v7 = vld [vmem:[%s788_s4] sm:$0xff]  ;;  %v24_v12 = vld [vmem:[%s787_s0 + $0x8] sm:$0xff]  ;;  %s687_s0 = smov 96  }
   0x5   :  { %653 = vmatprep.subr.bf16.mxu1 %v652_v3  ;;  %v656_v9 = vpack.c.bf16 %v188_v8, %v187_v7  ;;  %649 = vmatprep.subr.bf16.mxu0 %v648_v6  ;;  %v186_v14 = vld [vmem:[%s789_s3] sm:$0xf] }
   0x6   :  { %655 = vmatpush3.bf16.msra.mxu1 %v652_v3  ;;  %651 = vmatpush3.bf16.msra.mxu0 %v648_v6  ;;  %v570_v28 = vld [vmem:[%s790_s5] ss:$0 sm:$0xff] }
   0x7   :  { %665 = vmatprep.subr.bf16.mxu1 %v656_v9  ;;  %657 = vmatprep.subr.bf16.mxu0 %v656_v9 }
   0x9   :  { %614 = vmatmul.mubr.msk.f32.vlgmr.msra.gmra.mrb[0].mxu1 %vm27_vm0, %v24_v12  ;;  %607 = vmatmul.mubr.msk.f32.vlgmr.msra.gmra.mrb[0].mxu0 %vm27_vm0, %v24_v12 }
   0xa   :  { %667 = vmatpush3.bf16.msra.mxu1 %v656_v9  ;;  %659 = vmatpush3.bf16.msra.mxu0 %v656_v9 }
   0xb   :  { %669 = vmatprep.subr.bf16.mxu1 %v660_v13  ;;  %661 = vmatprep.subr.bf16.mxu0 %v660_v13 }
   0xe   :  { %671 = vmatpush3.bf16.msra.mxu1 %v660_v13  ;;  %663 = vmatpush3.bf16.msra.mxu0 %v660_v13 }
   0xf   :  { %627 = vmatprep.subr.msk.mxu0 %vm281_vm1, %v186_v14  ;;  %643 = vmatprep.subr.msk.mxu1 %vm281_vm1, %v186_v14 }
  0xdc   :  { %v615_v15 = vpop.f32.mrb[0].mxu1  ;;  %v608_v17 = vpop.f32.mrb[0].mxu0 }
  0xdd   :  { %v177_v16 = vpop.f32.mrb[1].mxu1  ;;  %v100_v18 = vpop.f32.mrb[1].mxu0 }
  0xde   :  { %372 = vrot.lane.b32.xlu0 %v177_v16, %s687_s0  ;;  %624 = vmatprep.mubr.msk.f32.mxu0 %vm192_vm2, %v177_v16 }
  0xdf   :  { %625 = vmatmul.mubr.msk.f32.vlgmr.msra.gmra.mrb[2].mxu0 %vm192_vm2, %v615_v15  ;;  %455 = vrot.lane.b32.xlu1 %v100_v18, %s688_s16 }
  0xe0   :  { %629 = vmatprep.mubr.msk.f32.mxu0 %vm274_vm3, %v100_v18  ;;  %628 = vmatpush3.msk.msra.mxu0 %vm281_vm1, %v186_v14 }
  0xe2   :  { %374 = vrot.lane.b32.xlu0 %v615_v15, %s687_s0 }
  0xe3   :  { %457 = vrot.lane.b32.xlu1 %v608_v17, %s688_s16 }
  0xe7   :  { %630 = vmatmul.mubr.msk.f32.vlgmr.msra.gmra.mrb[2].mxu0 %vm274_vm3, %v608_v17 }
 0x150   :  { %v373_v19 = vpop.permute.xlu0 %372 }
 0x151   :  { %640 = vmatprep.mubr.msk.f32.mxu1 %vm192_vm2, %v373_v19  ;;  %v456_v21 = vpop.permute.xlu1 %455 }
 0x154   :  { %v375_v20 = vpop.permute.xlu0 %374 }
 0x155   :  { %641 = vmatmul.mubr.msk.f32.vlgmr.msra.gmra.mrb[2].mxu1 %vm192_vm2, %v375_v20  ;;  %v458_v22 = vpop.permute.xlu1 %457 }
 0x156   :  { %644 = vmatpush3.msk.msra.mxu1 %vm281_vm1, %v186_v14  ;;  %645 = vmatprep.mubr.msk.f32.mxu1 %vm274_vm3, %v456_v21 }
 0x15d   :  { %646 = vmatmul.mubr.msk.f32.vlgmr.msra.gmra.mrb[2].mxu1 %vm274_vm3, %v458_v22 }
 0x1ba   :  { %v631_v23 = vpop.f32.mrb[2].mxu0 }
 0x1bb   :  { %v351_v24 = vpop.f32.mrb[3].mxu0  ;;  %v361_v34 = vmax.f32 %v631_v23, 0.0 }
 0x1bc   :  { %v360_v35 = vmax.f32 %v351_v24, 0.0 }
 0x1bd   :  { %v369_v36 = vadd.f32 %v570_v28, %v361_v34 }
 0x1be   :  { %v368_v37 = vadd.f32 %v570_v28, %v360_v35 }
 0x230   :  { %v647_v25 = vpop.f32.mrb[2].mxu1 }
 0x231   :  { %v539_v26 = vmax.f32 %v647_v25, 0.0  ;;  %v529_v27 = vpop.f32.mrb[3].mxu1 }
 0x232   :  { %v538_v29 = vmax.f32 %v529_v27, 0.0 }
 0x233   :  { %v541_v30 = vadd.f32 %v570_v28, %v539_v26 }
 0x234   :  { %v540_v31 = vadd.f32 %v570_v28, %v538_v29 }
 0x235   :  { %679 = vtanh.f32 %v541_v30 }
 0x236   :  { %681 = vtanh.f32 %v540_v31 }
 0x237   :  { %683 = vtanh.f32 %v369_v36 }
 0x238   :  { %685 = vtanh.f32 %v368_v37 }
 0x23f   :  { %v680_v32 = vpop.eup %679 }
 0x240   :  { %v682_v33 = vpop.eup %681  ;;  %548 = vrot.lane.b32.xlu1 %v680_v32, %s689_s18 }
 0x241   :  { %546 = vrot.lane.b32.xlu0 %v682_v33, %s689_s18  ;;  %v684_v38 = vpop.eup %683 }
 0x242   :  { %v686_v40 = vpop.eup %685 }
 0x2b2   :  { %v549_v39 = vpop.permute.xlu1 %548 }
 0x2b3   :  { %v553_v41 = vsel %vm192_vm2, %v684_v38, %v549_v39  ;;  %v547_v42 = vpop.permute.xlu0 %546 }
 0x2b4   :  { %556 = vst.msk [vmem:[%s791_s6 + $0x8] sm:$0xff] %vm554_vm4, %v553_v41  ;;  %v552_v43 = vsel %vm192_vm2, %v686_v40, %v547_v42 }
 0x2b5   :  { %555 = vst.msk [vmem:[%s791_s6] sm:$0xff] %vm554_vm4, %v552_v43 }

// kernel: encoder_forward.6
= control target key start
LH: loop header
LB: loop body
LE: loop exit
PB: predicated region body
PF: predicated region fallthrough
CT: control target
= control target key end

     0   :  { %vm27_vm0 = vcmask 130048   ;;  %vm195_vm1 = vcmask 261120   ;;  %s744_s21 = smov 96   ;;  %s745_s23 = smov 64   ;;  %vm570_vm2 = vcmask 523264   ;;  %s844_s2 = inlined_call_operand.vmem [shape: f32[16,64], index: 2, kind: input, shape index: {}]   ;;  %s845_s1 = inlined_call_operand.vmem [shape: f32[16,64], index: 1, kind: input, shape index: {}]   ;;  %s846_s0 = inlined_call_operand.vmem [shape: f32[16,16], index: 0, kind: input, shape index: {}]   ;;  %s847_s4 = inlined_call_operand.vmem [shape: f32[32,64], index: 4, kind: input, shape index: {}]   ;;  %s848_s3 = inlined_call_operand.vmem [shape: f32[32,64], index: 3, kind: input, shape index: {}]   ;;  %s849_s5 = inlined_call_operand.vmem [shape: f32[1,64], index: 5, kind: input, shape index: {}]   ;;  %s850_s6 = inlined_call_operand.vmem [shape: f32[16,128], index: 6, kind: output, shape index: {}]  }
   0x1   :  { %v109_v0 = vld [vmem:[%s844_s2] sm:$0xff]  ;;  %v110_v1 = vld [vmem:[%s844_s2 + $0x8] sm:$0xff]  ;;  %v192_v10 = vld [vmem:[%s847_s4 + $0x10] sm:$0xff] }
   0x2   :  { %v25_v2 = vld [vmem:[%s845_s1] sm:$0xff]  ;;  %v686_v3 = vpack.c.bf16 %v110_v1, %v109_v0  ;;  %v26_v4 = vld [vmem:[%s845_s1 + $0x8] sm:$0xff]  ;;  %v193_v11 = vld [vmem:[%s847_s4 + $0x18] sm:$0xff] }
   0x3   :  { %v23_v5 = vld [vmem:[%s846_s0] sm:$0xff]  ;;  %v682_v6 = vpack.c.bf16 %v26_v4, %v25_v2  ;;  %v191_v8 = vld [vmem:[%s847_s4 + $0x8] sm:$0xff]  ;;  %v694_v13 = vpack.c.bf16 %v193_v11, %v192_v10  ;;  %v188_v17 = vld [vmem:[%s848_s3 + $0x10] sm:$0xff] }
   0x4   :  { %635 = vmatprep.mubr.msk.f32.mxu1 %vm27_vm0, %v23_v5  ;;  %628 = vmatprep.mubr.msk.f32.mxu0 %vm27_vm0, %v23_v5  ;;  %v190_v7 = vld [vmem:[%s847_s4] sm:$0xff]  ;;  %v24_v12 = vld [vmem:[%s846_s0 + $0x8] sm:$0xff]  ;;  %v189_v18 = vld [vmem:[%s848_s3 + $0x18] sm:$0xff] }
   0x5   :  { %687 = vmatprep.subr.bf16.mxu1 %v686_v3  ;;  %v690_v9 = vpack.c.bf16 %v191_v8, %v190_v7  ;;  %683 = vmatprep.subr.bf16.mxu0 %v682_v6  ;;  %v186_v14 = vld [vmem:[%s848_s3] sm:$0xff]  ;;  %v187_v15 = vld [vmem:[%s848_s3 + $0x8] sm:$0xff]  ;;  %v702_v22 = vpack.c.bf16 %v189_v18, %v188_v17 }
   0x6   :  { %689 = vmatpush3.bf16.msra.mxu1 %v686_v3  ;;  %685 = vmatpush3.bf16.msra.mxu0 %v682_v6  ;;  %v698_v16 = vpack.c.bf16 %v187_v15, %v186_v14  ;;  %v587_v33 = vld [vmem:[%s849_s5] ss:$0 sm:$0xff] }
   0x7   :  { %707 = vmatprep.subr.bf16.mxu1 %v690_v9  ;;  %691 = vmatprep.subr.bf16.mxu0 %v690_v9 }
   0x9   :  { %636 = vmatmul.mubr.msk.f32.vlgmr.msra.gmra.mrb[0].mxu1 %vm27_vm0, %v24_v12  ;;  %629 = vmatmul.mubr.msk.f32.vlgmr.msra.gmra.mrb[0].mxu0 %vm27_vm0, %v24_v12 }
   0xa   :  { %709 = vmatpush3.bf16.msra.mxu1 %v690_v9  ;;  %693 = vmatpush3.bf16.msra.mxu0 %v690_v9 }
   0xb   :  { %711 = vmatprep.subr.bf16.mxu1 %v694_v13  ;;  %695 = vmatprep.subr.bf16.mxu0 %v694_v13 }
   0xe   :  { %713 = vmatpush3.bf16.msra.mxu1 %v694_v13  ;;  %697 = vmatpush3.bf16.msra.mxu0 %v694_v13 }
   0xf   :  { %699 = vmatprep.subr.bf16.mxu0 %v698_v16  ;;  %715 = vmatprep.subr.bf16.mxu1 %v698_v16 }
  0xdc   :  { %v637_v19 = vpop.f32.mrb[0].mxu1  ;;  %v630_v21 = vpop.f32.mrb[0].mxu0 }
  0xdd   :  { %v177_v20 = vpop.f32.mrb[1].mxu1  ;;  %v100_v23 = vpop.f32.mrb[1].mxu0 }
  0xde   :  { %380 = vrot.lane.b32.xlu0 %v177_v20, %s744_s21  ;;  %646 = vmatprep.mubr.msk.f32.mxu0 %vm195_vm1, %v177_v20 }
  0xdf   :  { %647 = vmatmul.mubr.msk.f32.vlgmr.msra.gmra.mrb[2].mxu0 %vm195_vm1, %v637_v19  ;;  %463 = vrot.lane.b32.xlu1 %v100_v23, %s744_s21 }
  0xe0   :  { %701 = vmatpush3.bf16.msra.mxu0 %v698_v16  ;;  %657 = vmatprep.mubr.msk.f32.mxu0 %vm195_vm1, %v100_v23 }
  0xe1   :  { %703 = vmatprep.subr.bf16.mxu0 %v702_v22 }
  0xe2   :  { %382 = vrot.lane.b32.xlu0 %v637_v19, %s744_s21 }
  0xe3   :  { %465 = vrot.lane.b32.xlu1 %v630_v21, %s744_s21 }
  0xe4   :  { %705 = vmatpush3.bf16.msra.mxu0 %v702_v22 }
  0xe7   :  { %658 = vmatmul.mubr.msk.f32.vlgmr.msra.gmra.mrb[2].mxu0 %vm195_vm1, %v630_v21 }
 0x150   :  { %v381_v24 = vpop.permute.xlu0 %380 }
 0x151   :  { %668 = vmatprep.mubr.msk.f32.mxu1 %vm195_vm1, %v381_v24  ;;  %v464_v26 = vpop.permute.xlu1 %463 }
 0x154   :  { %v383_v25 = vpop.permute.xlu0 %382 }
 0x155   :  { %669 = vmatmul.mubr.msk.f32.vlgmr.msra.gmra.mrb[2].mxu1 %vm195_vm1, %v383_v25  ;;  %v466_v27 = vpop.permute.xlu1 %465 }
 0x156   :  { %717 = vmatpush3.bf16.msra.mxu1 %v698_v16  ;;  %679 = vmatprep.mubr.msk.f32.mxu1 %vm195_vm1, %v464_v26 }
 0x157   :  { %719 = vmatprep.subr.bf16.mxu1 %v702_v22 }
 0x15a   :  { %721 = vmatpush3.bf16.msra.mxu1 %v702_v22 }
 0x15d   :  { %680 = vmatmul.mubr.msk.f32.vlgmr.msra.gmra.mrb[2].mxu1 %vm195_vm1, %v466_v27 }
 0x1ba   :  { %v659_v28 = vpop.f32.mrb[2].mxu0 }
 0x1bb   :  { %v349_v29 = vpop.f32.mrb[3].mxu0  ;;  %v359_v47 = vmax.f32 %v659_v28, 0.0 }
 0x1bc   :  { %v358_v48 = vmax.f32 %v349_v29, 0.0 }
 0x1bd   :  { %v367_v49 = vadd.f32 %v587_v33, %v359_v47 }
 0x1be   :  { %v366_v50 = vadd.f32 %v587_v33, %v358_v48 }
 0x1bf   :  { %v369_v51 = vsub.f32 0.0, %v367_v49 }
 0x1c0   :  { %v368_v52 = vsub.f32 0.0, %v366_v50 }
 0x1c1   :  { %v372_v53 = vmul.f32 1.442695, %v369_v51 }
 0x1c2   :  { %v370_v54 = vmul.f32 1.442695, %v368_v52 }
 0x230   :  { %v681_v30 = vpop.f32.mrb[2].mxu1 }
 0x231   :  { %v547_v31 = vmax.f32 %v681_v30, 0.0  ;;  %v537_v32 = vpop.f32.mrb[3].mxu1 }
 0x232   :  { %v546_v34 = vmax.f32 %v537_v32, 0.0 }
 0x233   :  { %v549_v35 = vadd.f32 %v587_v33, %v547_v31 }
 0x234   :  { %v548_v36 = vadd.f32 %v587_v33, %v546_v34 }
 0x235   :  { %v551_v37 = vsub.f32 0.0, %v549_v35 }
 0x236   :  { %v550_v38 = vsub.f32 0.0, %v548_v36 }
 0x237   :  { %v554_v39 = vmul.f32 1.442695, %v551_v37 }
 0x238   :  { %v552_v40 = vmul.f32 1.442695, %v550_v38 }
 0x239   :  { %728 = vpow2.f32 %v554_v39 }
 0x23a   :  { %730 = vpow2.f32 %v552_v40 }
 0x243   :  { %v729_v41 = vpop.eup %728 }
 0x244   :  { %v731_v42 = vpop.eup %730  ;;  %v557_v43 = vadd.f32 1.0, %v729_v41 }
 0x245   :  { %v556_v44 = vadd.f32 1.0, %v731_v42 }
 0x246   :  { %732 = vrcp.f32 %v557_v43 }
 0x247   :  { %734 = vrcp.f32 %v556_v44 }
 0x248   :  { %736 = vpow2.f32 %v372_v53 }
 0x249   :  { %738 = vpow2.f32 %v370_v54 }
 0x250   :  { %v733_v45 = vpop.eup %732 }
 0x251   :  { %v735_v46 = vpop.eup %734  ;;  %566 = vrot.lane.b32.xlu1 %v733_v45, %s745_s23 }
 0x252   :  { %564 = vrot.lane.b32.xlu0 %v735_v46, %s745_s23  ;;  %v737_v55 = vpop.eup %736 }
 0x253   :  { %v739_v56 = vpop.eup %738  ;;  %v375_v57 = vadd.f32 1.0, %v737_v55 }
 0x254   :  { %v374_v58 = vadd.f32 1.0, %v739_v56 }
 0x255   :  { %740 = vrcp.f32 %v375_v57 }
 0x256   :  { %742 = vrcp.f32 %v374_v58 }
 0x25f   :  { %v741_v59 = vpop.eup %740 }
 0x260   :  { %v743_v61 = vpop.eup %742 }
 0x2c3   :  { %v567_v60 = vpop.permute.xlu1 %566 }
 0x2c4   :  { %v572_v62 = vsel %vm570_vm2, %v741_v59, %v567_v60  ;;  %v565_v63 = vpop.permute.xlu0 %564 }
 0x2c5   :  { %574 = vst [vmem:[%s850_s6 + $0x8] sm:$0xff] %v572_v62  ;;  %v571_v0 = vsel %vm570_vm2, %v743_v61, %v565_v63 }
 0x2c6   :  { %573 = vst [vmem:[%s850_s6] sm:$0xff] %v571_v0 }

// kernel: encoder_forward.7
= control target key start
LH: loop header
LB: loop body
LE: loop exit
PB: predicated region body
PF: predicated region fallthrough
CT: control target
= control target key end

     0   :  { %vm27_vm0 = vcmask 130048   ;;  %vm195_vm1 = vcmask 261120   ;;  %s716_s21 = smov 96   ;;  %s717_s23 = smov 32   ;;  %vm552_vm2 = vcmask 523264   ;;  %s818_s2 = inlined_call_operand.vmem [shape: f32[16,64], index: 2, kind: input, shape index: {}]   ;;  %s819_s1 = inlined_call_operand.vmem [shape: f32[16,64], index: 1, kind: input, shape index: {}]   ;;  %s820_s0 = inlined_call_operand.vmem [shape: f32[16,16], index: 0, kind: input, shape index: {}]   ;;  %s821_s4 = inlined_call_operand.vmem [shape: f32[32,32], index: 4, kind: input, shape index: {}]   ;;  %s822_s3 = inlined_call_operand.vmem [shape: f32[32,32], index: 3, kind: input, shape index: {}]   ;;  %s823_s5 = inlined_call_operand.vmem [shape: f32[1,32], index: 5, kind: input, shape index: {}]   ;;  %s824_s6 = inlined_call_operand.vmem [shape: f32[16,64], index: 6, kind: output, shape index: {}]  }
   0x1   :  { %v109_v0 = vld [vmem:[%s818_s2] sm:$0xff]  ;;  %v110_v1 = vld [vmem:[%s818_s2 + $0x8] sm:$0xff]  ;;  %v192_v10 = vld [vmem:[%s821_s4 + $0x10] sm:$0xff] }
   0x2   :  { %v25_v2 = vld [vmem:[%s819_s1] sm:$0xff]  ;;  %v666_v3 = vpack.c.bf16 %v110_v1, %v109_v0  ;;  %v26_v4 = vld [vmem:[%s819_s1 + $0x8] sm:$0xff]  ;;  %v193_v11 = vld [vmem:[%s821_s4 + $0x18] sm:$0xff] }
   0x3   :  { %v23_v5 = vld [vmem:[%s820_s0] sm:$0xff]  ;;  %v662_v6 = vpack.c.bf16 %v26_v4, %v25_v2  ;;  %v191_v8 = vld [vmem:[%s821_s4 + $0x8] sm:$0xff]  ;;  %v674_v13 = vpack.c.bf16 %v193_v11, %v192_v10  ;;  %v188_v17 = vld [vmem:[%s822_s3 + $0x10] sm:$0xff] }
   0x4   :  { %615 = vmatprep.mubr.msk.f32.mxu1 %vm27_vm0, %v23_v5  ;;  %608 = vmatprep.mubr.msk.f32.mxu0 %vm27_vm0, %v23_v5  ;;  %v190_v7 = vld [vmem:[%s821_s4] sm:$0xff]  ;;  %v24_v12 = vld [vmem:[%s820_s0 + $0x8] sm:$0xff]  ;;  %v189_v18 = vld [vmem:[%s822_s3 + $0x18] sm:$0xff] }
   0x5   :  { %667 = vmatprep.subr.bf16.mxu1 %v666_v3  ;;  %v670_v9 = vpack.c.bf16 %v191_v8, %v190_v7  ;;  %663 = vmatprep.subr.bf16.mxu0 %v662_v6  ;;  %v186_v14 = vld [vmem:[%s822_s3] sm:$0xff]  ;;  %v187_v15 = vld [vmem:[%s822_s3 + $0x8] sm:$0xff]  ;;  %v682_v22 = vpack.c.bf16 %v189_v18, %v188_v17 }
   0x6   :  { %669 = vmatpush3.bf16.msra.mxu1 %v666_v3  ;;  %665 = vmatpush3.bf16.msra.mxu0 %v662_v6  ;;  %v678_v16 = vpack.c.bf16 %v187_v15, %v186_v14  ;;  %v567_v33 = vld [vmem:[%s823_s5] ss:$0 sm:$0xff] }
   0x7   :  { %687 = vmatprep.subr.bf16.mxu1 %v670_v9  ;;  %671 = vmatprep.subr.bf16.mxu0 %v670_v9 }
   0x9   :  { %616 = vmatmul.mubr.msk.f32.vlgmr.msra.gmra.mrb[0].mxu1 %vm27_vm0, %v24_v12  ;;  %609 = vmatmul.mubr.msk.f32.vlgmr.msra.gmra.mrb[0].mxu0 %vm27_vm0, %v24_v12 }
   0xa   :  { %689 = vmatpush3.bf16.msra.mxu1 %v670_v9  ;;  %673 = vmatpush3.bf16.msra.mxu0 %v670_v9 }
   0xb   :  { %691 = vmatprep.subr.bf16.mxu1 %v674_v13  ;;  %675 = vmatprep.subr.bf16.mxu0 %v674_v13 }
   0xe   :  { %693 = vmatpush3.bf16.msra.mxu1 %v674_v13  ;;  %677 = vmatpush3.bf16.msra.mxu0 %v674_v13 }
   0xf   :  { %679 = vmatprep.subr.bf16.mxu0 %v678_v16  ;;  %695 = vmatprep.subr.bf16.mxu1 %v678_v16 }
  0xdc   :  { %v617_v19 = vpop.f32.mrb[0].mxu1  ;;  %v610_v21 = vpop.f32.mrb[0].mxu0 }
  0xdd   :  { %v177_v20 = vpop.f32.mrb[1].mxu1  ;;  %v100_v23 = vpop.f32.mrb[1].mxu0 }
  0xde   :  { %370 = vrot.lane.b32.xlu0 %v177_v20, %s716_s21  ;;  %626 = vmatprep.mubr.msk.f32.mxu0 %vm195_vm1, %v177_v20 }
  0xdf   :  { %627 = vmatmul.mubr.msk.f32.vlgmr.msra.gmra.mrb[2].mxu0 %vm195_vm1, %v617_v19  ;;  %453 = vrot.lane.b32.xlu1 %v100_v23, %s716_s21 }
  0xe0   :  { %681 = vmatpush3.bf16.msra.mxu0 %v678_v16  ;;  %637 = vmatprep.mubr.msk.f32.mxu0 %vm195_vm1, %v100_v23 }
  0xe1   :  { %683 = vmatprep.subr.bf16.mxu0 %v682_v22 }
  0xe2   :  { %372 = vrot.lane.b32.xlu0 %v617_v19, %s716_s21 }
  0xe3   :  { %455 = vrot.lane.b32.xlu1 %v610_v21, %s716_s21 }
  0xe4   :  { %685 = vmatpush3.bf16.msra.mxu0 %v682_v22 }
  0xe7   :  { %638 = vmatmul.mubr.msk.f32.vlgmr.msra.gmra.mrb[2].mxu0 %vm195_vm1, %v610_v21 }
 0x150   :  { %v371_v24 = vpop.permute.xlu0 %370 }
 0x151   :  { %648 = vmatprep.mubr.msk.f32.mxu1 %vm195_vm1, %v371_v24  ;;  %v454_v26 = vpop.permute.xlu1 %453 }
 0x154   :  { %v373_v25 = vpop.permute.xlu0 %372 }
 0x155   :  { %649 = vmatmul.mubr.msk.f32.vlgmr.msra.gmra.mrb[2].mxu1 %vm195_vm1, %v373_v25  ;;  %v456_v27 = vpop.permute.xlu1 %455 }
 0x156   :  { %697 = vmatpush3.bf16.msra.mxu1 %v678_v16  ;;  %659 = vmatprep.mubr.msk.f32.mxu1 %vm195_vm1, %v454_v26 }
 0x157   :  { %699 = vmatprep.subr.bf16.mxu1 %v682_v22 }
 0x15a   :  { %701 = vmatpush3.bf16.msra.mxu1 %v682_v22 }
 0x15d   :  { %660 = vmatmul.mubr.msk.f32.vlgmr.msra.gmra.mrb[2].mxu1 %vm195_vm1, %v456_v27 }
 0x1ba   :  { %v639_v28 = vpop.f32.mrb[2].mxu0 }
 0x1bb   :  { %v349_v29 = vpop.f32.mrb[3].mxu0  ;;  %v359_v39 = vmax.f32 %v639_v28, 0.0 }
 0x1bc   :  { %v358_v40 = vmax.f32 %v349_v29, 0.0 }
 0x1bd   :  { %v367_v41 = vadd.f32 %v567_v33, %v359_v39 }
 0x1be   :  { %v366_v42 = vadd.f32 %v567_v33, %v358_v40 }
 0x230   :  { %v661_v30 = vpop.f32.mrb[2].mxu1 }
 0x231   :  { %v537_v31 = vmax.f32 %v661_v30, 0.0  ;;  %v527_v32 = vpop.f32.mrb[3].mxu1 }
 0x232   :  { %v536_v34 = vmax.f32 %v527_v32, 0.0 }
 0x233   :  { %v539_v35 = vadd.f32 %v567_v33, %v537_v31 }
 0x234   :  { %v538_v36 = vadd.f32 %v567_v33, %v536_v34 }
 0x235   :  { %708 = vtanh.f32 %v539_v35 }
 0x236   :  { %710 = vtanh.f32 %v538_v36 }
 0x237   :  { %712 = vtanh.f32 %v367_v41 }
 0x238   :  { %714 = vtanh.f32 %v366_v42 }
 0x23f   :  { %v709_v37 = vpop.eup %708 }
 0x240   :  { %v711_v38 = vpop.eup %710  ;;  %546 = vrot.lane.b32.xlu1 %v709_v37, %s717_s23 }
 0x241   :  { %544 = vrot.lane.b32.xlu0 %v711_v38, %s717_s23  ;;  %v713_v43 = vpop.eup %712 }
 0x242   :  { %v715_v45 = vpop.eup %714 }
 0x2b2   :  { %v547_v44 = vpop.permute.xlu1 %546 }
 0x2b3   :  { %v551_v46 = vsel %vm195_vm1, %v713_v43, %v547_v44  ;;  %v545_v47 = vpop.permute.xlu0 %544 }
 0x2b4   :  { %554 = vst.msk [vmem:[%s824_s6 + $0x8] sm:$0xff] %vm552_vm2, %v551_v46  ;;  %v550_v48 = vsel %vm195_vm1, %v715_v45, %v545_v47 }
 0x2b5   :  { %553 = vst.msk [vmem:[%s824_s6] sm:$0xff] %vm552_vm2, %v550_v48 }

</bundles_post_ra>
